<compile_context>
chip_gen: v7x
topology: tpu7x:2x2x1
jax: 0.10.0
libtpu: 0.0.40
codegen_flags: <defaults>
</compile_context>

<pallas_src>
import functools

import jax
import jax.numpy as jnp
from jax.experimental import pallas as pl
from jax.experimental.pallas import tpu as pltpu


def _round_up(x, m):
    return (x + m - 1) // m * m


# -----------------------------------------------------------------------------
# Kernels
# -----------------------------------------------------------------------------
def _cbow_fused_kernel(x_ref, w1_ref, b1_ref, w2_ref, out_ref):
    """Whole (padded) vocab in one tile: write normalized log-probs directly.

    x_ref  : (Bt, in_pad)     bf16   streamed per batch tile
    w1_ref : (in_pad, H_pad)  bf16   resident
    b1_ref : (1, H_pad)       f32    resident (bias-1 column at hidden_size)
    w2_ref : (H_pad, V_pad)   bf16   resident (row hidden_size = b2 / -1e30)
    out_ref: (Bt, V_pad)      f32    log-probs
    """
    h = jnp.dot(x_ref[...], w1_ref[...], preferred_element_type=jnp.float32)
    h = jnp.maximum(h + b1_ref[...], 0.0).astype(jnp.bfloat16)
    logits = jnp.dot(h, w2_ref[...], preferred_element_type=jnp.float32)
    m = jnp.max(logits, axis=-1, keepdims=True)
    lse = m + jnp.log(jnp.sum(jnp.exp(logits - m), axis=-1, keepdims=True))
    out_ref[...] = logits - lse


def _cbow_streamed_kernel(x_ref, w1_ref, b1_ref, w2_ref,
                          logits_ref, lse_ref,
                          h_scr, m_scr, s_scr):
    """Large-vocab path: vocab streamed in wide tiles, online logsumexp.

    Grid = (batch tiles "parallel", vocab tiles "arbitrary").
    Outputs raw logits plus per-row logsumexp; the final subtraction is a
    cheap JAX epilogue (already-written vocab tiles can't be rescaled).
    """
    vi = pl.program_id(1)
    n_vi = pl.num_programs(1)

    # Once per batch tile: hidden layer (single K = 2*C*E matmul) + relu.
    @pl.when(vi == 0)
    def _():
        h = jnp.dot(x_ref[...], w1_ref[...], preferred_element_type=jnp.float32)
        h_scr[...] = jnp.maximum(h + b1_ref[...], 0.0).astype(jnp.bfloat16)
        m_scr[...] = jnp.full_like(m_scr, -jnp.inf)
        s_scr[...] = jnp.zeros_like(s_scr)

    # Every vocab tile: second matmul (bias folded into W2) + online LSE.
    logits = jnp.dot(h_scr[...], w2_ref[...], preferred_element_type=jnp.float32)
    logits_ref[...] = logits

    m_prev = m_scr[...]
    m_new = jnp.maximum(m_prev, jnp.max(logits, axis=-1, keepdims=True))
    s_scr[...] = (s_scr[...] * jnp.exp(m_prev - m_new)
                  + jnp.sum(jnp.exp(logits - m_new), axis=-1, keepdims=True))
    m_scr[...] = m_new

    @pl.when(vi == n_vi - 1)
    def _():
        lse_ref[...] = m_scr[...] + jnp.log(s_scr[...])


# -----------------------------------------------------------------------------
# Parameter prep (one-time)
# -----------------------------------------------------------------------------
def prepare_params(emb_table, w1, b1, w2, b2, *, vocab_tile=512):
    """Transpose to (in, out), pad to lane multiples, fold b2 into W2, cast bf16."""
    vocab_size, _emb_dim = emb_table.shape
    hidden_size, in_features = w1.shape
    assert w2.shape == (vocab_size, hidden_size)

    in_pad = _round_up(in_features, 128)
    # +1 guarantees a spare hidden column for the folded b2 bias row.
    hidden_pad = _round_up(hidden_size + 1, 128)
    vocab_pad = _round_up(vocab_size, vocab_tile)

    w1_t = jnp.zeros((in_pad, hidden_pad), jnp.float32)
    w1_t = w1_t.at[:in_features, :hidden_size].set(w1.T)

    # Bias-1 column: W1 column `hidden_size` is zero and b1 there is 1.0, so
    # relu gives exactly 1.0 -> multiplying W2 row `hidden_size` adds the bias.
    b1_p = jnp.zeros((1, hidden_pad), jnp.float32)
    b1_p = b1_p.at[0, :hidden_size].set(b1).at[0, hidden_size].set(1.0)

    # W2 transposed; bias row carries b2 for real lanes, -1e30 for padded vocab
    # lanes so they never win the max and exp() underflows to 0.
    w2_t = jnp.zeros((hidden_pad, vocab_pad), jnp.float32)
    w2_t = w2_t.at[:hidden_size, :vocab_size].set(w2.T)
    w2_t = w2_t.at[hidden_size, :].set(-1e30)
    w2_t = w2_t.at[hidden_size, :vocab_size].set(b2)

    return {
        "emb": emb_table.astype(jnp.bfloat16),   # gathered in the wrapper
        "w1": w1_t.astype(jnp.bfloat16),
        "b1": b1_p,                              # f32 (added post-matmul)
        "w2": w2_t.astype(jnp.bfloat16),
    }


# -----------------------------------------------------------------------------
# Forward wrapper
# -----------------------------------------------------------------------------
def cbow_forward(ids, params, *, batch_tile=None, vocab_tile=512,
                 fused_vmem_budget_bytes=8 << 20):
    """ids: (B, 2*context_size) int32 token ids -> (B, vocab_size) log-probs."""
    emb, w1, b1, w2 = params["emb"], params["w1"], params["b1"], params["w2"]
    vocab_size, emb_dim = emb.shape
    in_pad, hidden_pad = w1.shape
    vocab_pad = w2.shape[1]

    batch, n_ctx = ids.shape
    in_features = n_ctx * emb_dim

    # Embedding lookup hoisted to XLA (one gather), already bf16.
    x = jnp.take(emb, ids.reshape(-1), axis=0).reshape(batch, in_features)

    # Batch tiling: >= 2 tiles whenever the batch allows (v7x megacore),
    # capped at 128 rows so the MXU M dimension is well filled.
    if batch_tile is None:
        if batch <= 16:
            batch_tile = _round_up(batch, 8)
        elif batch <= 256:
            batch_tile = _round_up(_round_up(batch, 8) // 2, 8)
        else:
            batch_tile = 128
    batch_pad = _round_up(batch, batch_tile)
    n_batch_tiles = batch_pad // batch_tile

    x_p = jnp.zeros((batch_pad, in_pad), jnp.bfloat16)
    x_p = x_p.at[:batch, :in_features].set(x)

    # ---- fused path: whole padded vocab in one tile, normalize in-kernel ----
    fused_bytes = 2 * (batch_tile * vocab_pad * 4        # logits out (dbl-buf)
                       + hidden_pad * vocab_pad * 2      # resident W2
                       + batch_tile * in_pad * 2)        # streamed x
    if fused_bytes <= fused_vmem_budget_bytes:
        out = pl.pallas_call(
            _cbow_fused_kernel,
            out_shape=jax.ShapeDtypeStruct((batch_pad, vocab_pad), jnp.float32),
            grid_spec=pltpu.PrefetchScalarGridSpec(
                num_scalar_prefetch=0,
                grid=(n_batch_tiles,),
                in_specs=[
                    pl.BlockSpec((batch_tile, in_pad), lambda bi: (bi, 0)),
                    pl.BlockSpec((in_pad, hidden_pad), lambda bi: (0, 0)),
                    pl.BlockSpec((1, hidden_pad), lambda bi: (0, 0)),
                    pl.BlockSpec((hidden_pad, vocab_pad), lambda bi: (0, 0)),
                ],
                out_specs=pl.BlockSpec((batch_tile, vocab_pad),
                                       lambda bi: (bi, 0)),
            ),
            compiler_params=pltpu.CompilerParams(
                dimension_semantics=("parallel",)),
        )(x_p, w1, b1, w2)
        return out[:batch, :vocab_size]

    # ---- streamed path: wide vocab tiles + online logsumexp ----------------
    assert vocab_pad % vocab_tile == 0
    n_vocab_tiles = vocab_pad // vocab_tile

    logits, lse = pl.pallas_call(
        _cbow_streamed_kernel,
        out_shape=(
            jax.ShapeDtypeStruct((batch_pad, vocab_pad), jnp.float32),
            jax.ShapeDtypeStruct((batch_pad, 1), jnp.float32),
        ),
        grid_spec=pltpu.PrefetchScalarGridSpec(
            num_scalar_prefetch=0,
            grid=(n_batch_tiles, n_vocab_tiles),
            in_specs=[
                pl.BlockSpec((batch_tile, in_pad), lambda bi, vi: (bi, 0)),
                pl.BlockSpec((in_pad, hidden_pad), lambda bi, vi: (0, 0)),
                pl.BlockSpec((1, hidden_pad), lambda bi, vi: (0, 0)),
                pl.BlockSpec((hidden_pad, vocab_tile), lambda bi, vi: (0, vi)),
            ],
            out_specs=[
                pl.BlockSpec((batch_tile, vocab_tile), lambda bi, vi: (bi, vi)),
                pl.BlockSpec((batch_tile, 1), lambda bi, vi: (bi, 0)),
            ],
            scratch_shapes=[
                pltpu.VMEM((batch_tile, hidden_pad), jnp.bfloat16),  # hidden
                pltpu.VMEM((batch_tile, 1), jnp.float32),            # run max
                pltpu.VMEM((batch_tile, 1), jnp.float32),            # run sum
            ],
        ),
        compiler_params=pltpu.CompilerParams(
            dimension_semantics=("parallel", "arbitrary")),
    )(x_p, w1, b1, w2)

    # Cheap epilogue: log_softmax = logits - logsumexp; drop padding.
    return logits[:batch, :vocab_size] - lse[:batch]


# -----------------------------------------------------------------------------
# Pure-JAX reference (mirrors the kernel's bf16 rounding of x / W1 / W2 / b2)
# -----------------------------------------------------------------------------
def reference_forward(ids, emb_table, w1, b1, w2, b2):
    batch = ids.shape[0]
    x = jnp.take(emb_table, ids.reshape(-1), axis=0).reshape(batch, -1)
    x = x.astype(jnp.bfloat16).astype(jnp.float32)
    w1b = w1.astype(jnp.bfloat16).astype(jnp.float32)
    w2b = w2.astype(jnp.bfloat16).astype(jnp.float32)
    b2b = b2.astype(jnp.bfloat16).astype(jnp.float32)   # b2 folded into bf16 W2
    h = jnp.maximum(x @ w1b.T + b1, 0.0)
    h = h.astype(jnp.bfloat16).astype(jnp.float32)
    logits = h @ w2b.T + b2b
    return jax.nn.log_softmax(logits, axis=-1)


if __name__ == "__main__":
    context_size = 2
    embedding_size = 32        # 2*C*E = 128 -> lane-aligned flattened input
    hidden_size = 32           # padded to 128 (incl. folded-bias column)
    vocab_size = 1000          # pads to 1024 with vocab_tile=512
    batch = 64                 # -> 2 batch tiles of 32 (both v7x TCs busy)

    key = jax.random.PRNGKey(0)
    k_emb, k_w1, k_b1, k_w2, k_b2, k_in = jax.random.split(key, 6)

    emb_table = jax.random.normal(k_emb, (vocab_size, embedding_size), jnp.float32)
    in1 = 2 * context_size * embedding_size
    w1 = jax.random.normal(k_w1, (hidden_size, in1), jnp.float32) * 0.05
    b1 = jax.random.normal(k_b1, (hidden_size,), jnp.float32) * 0.05
    w2 = jax.random.normal(k_w2, (vocab_size, hidden_size), jnp.float32) * 0.05
    b2 = jax.random.normal(k_b2, (vocab_size,), jnp.float32) * 0.05

    # B batched context windows of 2*context_size token ids each.
    ids = jax.random.randint(k_in, (batch, 2 * context_size), 0, vocab_size,
                             dtype=jnp.int32)

    params = prepare_params(emb_table, w1, b1, w2, b2, vocab_tile=512)
    ref = reference_forward(ids, emb_table, w1, b1, w2, b2)

    # Fused path: whole padded vocab in one tile, log-softmax in-kernel.
    fwd_fused = jax.jit(functools.partial(cbow_forward, vocab_tile=512))
    out = jax.block_until_ready(fwd_fused(ids, params))
    assert out.shape == (batch, vocab_size)
    err = float(jnp.max(jnp.abs(out - ref)))
    assert jnp.allclose(out, ref, atol=2e-3, rtol=2e-3), err

    # Streamed path (wide vocab tiles + online logsumexp), forced via budget=0,
    # to keep the large-vocab code path exercised.
    fwd_streamed = jax.jit(functools.partial(
        cbow_forward, vocab_tile=512, fused_vmem_budget_bytes=0))
    out_s = jax.block_until_ready(fwd_streamed(ids, params))
    err = float(jnp.max(jnp.abs(out_s - ref)))
    assert jnp.allclose(out_s, ref, atol=2e-3, rtol=2e-3), err

    print("KERNEL_OK")
</pallas_src>

<mosaic_0001>
module attributes {stable_mosaic.version = 11 : i64} {
  func.func @_cbow_fused_kernel(%arg0: i32, %arg1: memref<32x128xbf16, #tpu.memory_space<vmem>>, %arg2: memref<128x128xbf16, #tpu.memory_space<vmem>>, %arg3: memref<1x128xf32, #tpu.memory_space<vmem>>, %arg4: memref<128x1024xbf16, #tpu.memory_space<vmem>>, %arg5: memref<32x1024xf32, #tpu.memory_space<vmem>>) attributes {dimension_semantics = [#tpu.dimension_semantics<parallel>], iteration_bounds = array<i64: 2>, scalar_prefetch = 0 : i64, scratch_operands = 0 : i64, tpu.core_type = #tpu.core_type<tc>, window_params = [{transform_indices = @transform_0, window_bounds = array<i64: 32, 128>}, {pipeline_mode = #tpu.pipeline_mode<synchronous>, transform_indices = @transform_1, window_bounds = array<i64: 128, 128>}, {pipeline_mode = #tpu.pipeline_mode<synchronous>, transform_indices = @transform_2, window_bounds = array<i64: 1, 128>}, {pipeline_mode = #tpu.pipeline_mode<synchronous>, transform_indices = @transform_3, window_bounds = array<i64: 128, 1024>}, {transform_indices = @transform_4, window_bounds = array<i64: 32, 1024>}]} {
    %c0 = arith.constant 0 : index
    %c0_0 = arith.constant 0 : index
    %0 = vector.load %arg1[%c0, %c0_0] : memref<32x128xbf16, #tpu.memory_space<vmem>>, vector<32x128xbf16>
    %c0_1 = arith.constant 0 : index
    %c0_2 = arith.constant 0 : index
    %1 = vector.load %arg2[%c0_1, %c0_2] : memref<128x128xbf16, #tpu.memory_space<vmem>>, vector<128x128xbf16>
    %cst = arith.constant dense<0.000000e+00> : vector<32x128xf32>
    %2 = tpu.matmul %0, %1, %cst {dimension_numbers = #tpu.dot_dimension_numbers<[1], [0], [0], [1], [0, 0, 1, 1], [], []>} : vector<32x128xbf16>, vector<128x128xbf16>, vector<32x128xf32> -> vector<32x128xf32>
    %c0_3 = arith.constant 0 : index
    %c0_4 = arith.constant 0 : index
    %3 = vector.load %arg3[%c0_3, %c0_4] : memref<1x128xf32, #tpu.memory_space<vmem>>, vector<1x128xf32>
    %4 = vector.broadcast %3 : vector<1x128xf32> to vector<32x128xf32>
    %5 = arith.addf %2, %4 : vector<32x128xf32>
    %cst_5 = arith.constant 0.000000e+00 : f32
    %6 = vector.broadcast %cst_5 : f32 to vector<32x128xf32>
    %7 = arith.maximumf %5, %6 : vector<32x128xf32>
    %8 = arith.truncf %7 : vector<32x128xf32> to vector<32x128xbf16>
    %c0_6 = arith.constant 0 : index
    %c0_7 = arith.constant 0 : index
    %9 = vector.load %arg4[%c0_6, %c0_7] : memref<128x1024xbf16, #tpu.memory_space<vmem>>, vector<128x1024xbf16>
    %cst_8 = arith.constant dense<0.000000e+00> : vector<32x1024xf32>
    %10 = tpu.matmul %8, %9, %cst_8 {dimension_numbers = #tpu.dot_dimension_numbers<[1], [0], [0], [1], [0, 0, 1, 1], [], []>} : vector<32x128xbf16>, vector<128x1024xbf16>, vector<32x1024xf32> -> vector<32x1024xf32>
    %cst_9 = arith.constant dense<0xFF800000> : vector<32xf32>
    %11 = vector.multi_reduction <maximumf>, %10, %cst_9 [1] : vector<32x1024xf32> to vector<32xf32>
    %12 = vector.shape_cast %11 : vector<32xf32> to vector<32x1xf32>
    %13 = vector.broadcast %12 : vector<32x1xf32> to vector<32x1024xf32>
    %14 = arith.subf %10, %13 : vector<32x1024xf32>
    %15 = math.exp %14 : vector<32x1024xf32>
    %cst_10 = arith.constant dense<0.000000e+00> : vector<32xf32>
    %16 = vector.multi_reduction <add>, %15, %cst_10 [1] : vector<32x1024xf32> to vector<32xf32>
    %17 = vector.shape_cast %16 : vector<32xf32> to vector<32x1xf32>
    %18 = math.log %17 : vector<32x1xf32>
    %19 = arith.addf %12, %18 : vector<32x1xf32>
    %20 = vector.broadcast %19 : vector<32x1xf32> to vector<32x1024xf32>
    %21 = arith.subf %10, %20 : vector<32x1024xf32>
    %c0_11 = arith.constant 0 : index
    %c0_12 = arith.constant 0 : index
    %22 = vector.load %arg5[%c0_11, %c0_12] : memref<32x1024xf32, #tpu.memory_space<vmem>>, vector<32x1024xf32>
    tpu.vector_store %arg5[%c0_11, %c0_12], %21 {strides = array<i32>} : memref<32x1024xf32, #tpu.memory_space<vmem>>, vector<32x1024xf32>,
    return
  }
  func.func @transform_0(%arg0: i32) -> (i32, i32) {
    %c0_i32 = arith.constant 0 : i32
    %c0_i32_0 = arith.constant 0 : i32
    return %arg0, %c0_i32 : i32, i32
  }
  func.func @transform_1(%arg0: i32) -> (i32, i32) {
    %c0_i32 = arith.constant 0 : i32
    %c0_i32_0 = arith.constant 0 : i32
    %c0_i32_1 = arith.constant 0 : i32
    return %c0_i32, %c0_i32_0 : i32, i32
  }
  func.func @transform_2(%arg0: i32) -> (i32, i32) {
    %c0_i32 = arith.constant 0 : i32
    %c0_i32_0 = arith.constant 0 : i32
    %c0_i32_1 = arith.constant 0 : i32
    return %c0_i32, %c0_i32_0 : i32, i32
  }
  func.func @transform_3(%arg0: i32) -> (i32, i32) {
    %c0_i32 = arith.constant 0 : i32
    %c0_i32_0 = arith.constant 0 : i32
    %c0_i32_1 = arith.constant 0 : i32
    return %c0_i32, %c0_i32_0 : i32, i32
  }
  func.func @transform_4(%arg0: i32) -> (i32, i32) {
    %c0_i32 = arith.constant 0 : i32
    %c0_i32_0 = arith.constant 0 : i32
    return %arg0, %c0_i32 : i32, i32
  }
}

</mosaic_0001>

<bundles_post_ra>
// kernel: cbow_forward.1
= control target key start
LH: loop header
LB: loop body
LE: loop exit
PB: predicated region body
PF: predicated region fallthrough
CT: control target
= control target key end

     0   :  { %9 = vsyncpa [#allocation3], 0  ;;  %s2228_s0 = inlined_call_operand.vmem [shape: bf16[64,128], index: 0, kind: input, shape index: {}]   ;;  %s2229_s1 = inlined_call_operand.vmem [shape: bf16[128,128], index: 1, kind: input, shape index: {}]   ;;  %s2230_s2 = inlined_call_operand.vmem [shape: f32[1,128], index: 2, kind: input, shape index: {}]   ;;  %s2231_s3 = inlined_call_operand.vmem [shape: bf16[128,1024], index: 3, kind: input, shape index: {}]   ;;  %s2232_s4 = inlined_call_operand.hbm [shape: f32[64,1024], index: 4, kind: output, shape index: {}]  }
   0x1   :  { %11 = vsyncpa [#allocation3 + $0x1], 0  ;;  %s1612_s15 = smov 0   ;;  %s1614_s16 = smov 0  }
   0x2   :  { %s1616_s17 = smov 0   ;;  %s1618_s18 = smov 0  }
   0x3 LB: > { %s1633_s19 = sadd.s32 4294967295, %s1581_s18   ;;  %s1259_s20 = sadd.s32 4294967294, %s1581_s18   ;;  %s1581_s18 = sphi %s1618_s18, %s2238_s18   ;;  %s1577_s17 = sphi %s1616_s17, %s2237_s17   ;;  %s1573_s16 = sphi %s1614_s16, %s2236_s16   ;;  %s1569_s15 = sphi %s1612_s15, %s2235_s15  }
   0x4   : > { %s1637_s21 = sadd.s32 1, %s1581_s18   ;;  %s113_s22 = sadd.s32 1, %s1577_s17 }
   0x5   : > { %s110_s23 = ssub.s32 %s1581_s18, %s1637_s21  ;;  %p123_p0 = scmp.ne.s32.totalorder %s1577_s17, %s1573_s16 }
   0x6   : > { %p111_p1 = scmp.eq.s32.totalorder %s110_s23, 0  ;;  %p124_p2 = scmp.eq.s32.totalorder %s1633_s19, 1 }
   0x7   : > { %p129_p3 = scmp.ne.s32.totalorder %s1573_s16, %s1569_s15  ;;  %p130_p4 = scmp.eq.s32.totalorder %s1259_s20, 1 }
   0x8   : > { %s1648_s24 = scalar_select %p111_p1, %s1577_s17, %s113_s22  }
   0x9   : > { %p1650_p5 = por %p124_p2, %p123_p0  ;;  %p1654_p6 = por %p130_p4, %p129_p3 }
   0xa   : > { %p1262_p7 = scmp.ge.s32.totalorder %s1581_s18, 1  ;;  %p166_p8 = scmp.lt.s32.totalorder %s1581_s18, 3 }
   0xc   : > { %p167_p9 = pnand %p1262_p7, %p166_p8 }
   0xd   : > { %v1437_v0 = vld [vmem:[%s2229_s1] sm:$0xff] (!%p167_p9)   ;;  %s1264_s29 = sshll.u32 (!%p167_p9), %s1633_s19, 2  ;;  %v1438_v1 = vld [vmem:[%s2229_s1 + $0x8] sm:$0xff] (!%p167_p9)   ;;  %v1439_v2 = vld [vmem:[%s2229_s1 + $0x10] sm:$0xff] (!%p167_p9)   ;;  %s189_s27 = sand.u32 (!%p167_p9), 1, %s1573_s16  }
   0xe   : > { %170 = sbr.rel (%p167_p9) target bundleno = 902 (0x386), region = 36  ;;  %p193_p10 = scmp.lt.s32.totalorder (!%p167_p9), %s1264_s29, 7  ;;  %1359 = vmatprep.subr.bf16.mxu0 (!%p167_p9), %v1437_v0  ;;  %v1440_v3 = vld [vmem:[%s2229_s1 + $0x18] sm:$0xff] (!%p167_p9)   ;;  %v342_v5 = vld [vmem:[%s2231_s3] sm:$0xff] (!%p167_p9)  ;;  %v1442_v17 = vld [vmem:[%s2229_s1 + $0x28] sm:$0xff] (!%p167_p9)  }
   0xf   : > { %1360 = vmatpush3.bf16.msra.mxu0 (!%p167_p9), %v1437_v0  ;;  %v346_v6 = vld [vmem:[%s2231_s3 + $0x20] sm:$0xff] (!%p167_p9)  ;;  %v1443_v22 = vld [vmem:[%s2229_s1 + $0x30] sm:$0xff] (!%p167_p9)   ;;  %v1444_v27 = vld [vmem:[%s2229_s1 + $0x38] sm:$0xff] (!%p167_p9)   ;;  %s1263_s28 = sshll.u32 (!%p167_p9), %s189_s27, 8  ;;  %s1348_s30 = sshll.u32 (!%p167_p9), %s1633_s19, 12 }
  0x10   : > { %1361 = vmatprep.subr.bf16.mxu0 (!%p167_p9), %v1438_v1  ;;  %v1278_v7 = vcombine.high (!%p167_p9), %v342_v5, %v346_v6  ;;  %v1277_v8 = vcombine.low (!%p167_p9), %v342_v5, %v346_v6  ;;  %v350_v9 = vld [vmem:[%s2231_s3 + $0x40] sm:$0xff] (!%p167_p9)  ;;  %v343_v30 = vld [vmem:[%s2231_s3 + $0x8] sm:$0xff] (!%p167_p9)  ;;  %s2169_s19 = scalar_lea.hbm (!%p167_p9), %s2232_s4, %s1348_s30  ;;  %s1584_s9 = smov (!%p167_p9), [#allocation2]  }
  0x11   : > { %v354_v10 = vld [vmem:[%s2231_s3 + $0x60] sm:$0xff] (!%p167_p9)  ;;  %v347_v31 = vld [vmem:[%s2231_s3 + $0x28] sm:$0xff] (!%p167_p9)  ;;  %s1523_s10 = sshll.u32 (!%p167_p9), %s1584_s9, 4  ;;  %s1524_s10 = int_to_ptr.vmem [resolvable:$false] %s1523_s10 }
  0x12   : > { %v1441_v11 = vld [vmem:[%s2229_s1 + $0x20] sm:$0xff] (!%p167_p9)   ;;  %v1286_v12 = vcombine.high (!%p167_p9), %v350_v9, %v354_v10  ;;  %726 = vmatprep.subr.bf16.mxu1 (!%p167_p9), %v1278_v7  ;;  %v1285_v15 = vcombine.low (!%p167_p9), %v350_v9, %v354_v10  ;;  %v1280_v34 = vcombine.high (!%p167_p9), %v343_v30, %v347_v31  ;;  %v351_v35 = vld [vmem:[%s2231_s3 + $0x48] sm:$0xff] (!%p167_p9)  ;;  %v1279_v39 = vcombine.low (!%p167_p9), %v343_v30, %v347_v31  ;;  %v344_v10 = vld [vmem:[%s2231_s3 + $0x10] sm:$0xff] (!%p167_p9)  ;;  %s1525_s12 = scalar_lea.vmem (!%p167_p9), %s1524_s10, 8192 }
  0x13   : > { %1362 = vmatpush3.bf16.msra.mxu0 (!%p167_p9), %v1438_v1  ;;  %v358_v13 = vld [vmem:[%s2231_s3 + $0x80] sm:$0xff] (!%p167_p9)  ;;  %727 = vmatpush1.bf16.msra.mxu1 (!%p167_p9), %v1277_v8  ;;  %v355_v36 = vld [vmem:[%s2231_s3 + $0x68] sm:$0xff] (!%p167_p9)  ;;  %v356_v31 = vld [vmem:[%s2231_s3 + $0x70] sm:$0xff] (!%p167_p9) }
  0x14   : > { %1363 = vmatprep.subr.bf16.mxu0 (!%p167_p9), %v1439_v2  ;;  %v362_v14 = vld [vmem:[%s2231_s3 + $0xa0] sm:$0xff] (!%p167_p9)  ;;  %728 = vmatprep.subr.bf16.mxu1 (!%p167_p9), %v1286_v12  ;;  %v1288_v40 = vcombine.high (!%p167_p9), %v351_v35, %v355_v36  ;;  %v359_v41 = vld [vmem:[%s2231_s3 + $0x88] sm:$0xff] (!%p167_p9)  ;;  %v1287_v43 = vcombine.low (!%p167_p9), %v351_v35, %v355_v36  ;;  %v345_v12 = vld [vmem:[%s2231_s3 + $0x18] sm:$0xff] (!%p167_p9) }
  0x15   : > { %s2240_s29 = smov (!%p193_p10, %s1264_s29), 7  ;;  %v1294_v16 = vcombine.high %v358_v13, %v362_v14  ;;  %v366_v18 = vld [vmem:[%s2231_s3 + $0xc0] sm:$0xff]  ;;  %v1293_v20 = vcombine.low %v358_v13, %v362_v14  ;;  %v363_v42 = vld [vmem:[%s2231_s3 + $0xa8] sm:$0xff]  ;;  %v349_v14 = vld [vmem:[%s2231_s3 + $0x38] sm:$0xff] }
  0x16   : > { %s1265_s8 = sshll.u32 %s2240_s29, 2  ;;  %v370_v19 = vld [vmem:[%s2231_s3 + $0xe0] sm:$0xff]  ;;  %v1296_v44 = vcombine.high %v359_v41, %v363_v42  ;;  %v367_v45 = vld [vmem:[%s2231_s3 + $0xc8] sm:$0xff]  ;;  %v1295_v47 = vcombine.low %v359_v41, %v363_v42  ;;  %v364_v41 = vld [vmem:[%s2231_s3 + $0xb0] sm:$0xff]  ;;  %s2115_s29 = scalar_lea.vmem [#allocation2], %s1263_s28 }
  0x17   : > { %s1673_s11 = scalar_lea.vmem %s2228_s0, %s1265_s8  ;;  %1364 = vmatpush3.bf16.msra.mxu0 %v1439_v2  ;;  %729 = vmatpush1.bf16.msra.mxu1 %v1285_v15  ;;  %v1302_v21 = vcombine.high %v366_v18, %v370_v19  ;;  %v374_v23 = vld [vmem:[%s2231_s3 + $0x100] sm:$0xff]  ;;  %v1301_v25 = vcombine.low %v366_v18, %v370_v19  ;;  %v371_v46 = vld [vmem:[%s2231_s3 + $0xe8] sm:$0xff]  ;;  %v1583_v18 = vmov 0   ;;  %v361_v42 = vld [vmem:[%s2231_s3 + $0x98] sm:$0xff]  ;;  %s1197_s5 = sshll.u32 %s2115_s29, 4  ;;  %s2171_s5 = int_to_ptr.vmem [resolvable:$true] %s1197_s5 }
  0x18   : > { %v1445_v4 = vld [vmem:[%s1673_s11] sm:$0xff]   ;;  %1365 = vmatprep.subr.bf16.mxu0 %v1440_v3  ;;  %730 = vmatprep.subr.bf16.mxu1 %v1294_v16  ;;  %v1446_v37 = vld [vmem:[%s1673_s11 + $0x8] sm:$0xff]   ;;  %v1304_v48 = vcombine.high %v367_v45, %v371_v46  ;;  %v1303_v51 = vcombine.low %v367_v45, %v371_v46  ;;  %v1800_v16 = vcombine.low %v345_v12, %v349_v14  ;;  %s2187_s8 = scalar_lea.sflag [#allocation3], %s189_s27  ;;  %s1519_s11 = scalar_lea.vmem %s2171_s5, 4096 }
  0x19   : > { %1375 = vmatprep.mubr.bf16.mxu0 %v1445_v4  ;;  %v378_v24 = vld [vmem:[%s2231_s3 + $0x120] sm:$0xff]  ;;  %v375_v49 = vld [vmem:[%s2231_s3 + $0x108] sm:$0xff]  ;;  %758 = vmatprep.mubr.bf16.mxu1 %v1583_v18  ;;  %p1520_p11 = scmp.ne.s32.totalorder %s2171_s5, %s1519_s11  ;;  %p1526_p0 = scmp.lt.s32.totalorder %s2171_s5, %s1524_s10 }
  0x1a   : > { %v1310_v26 = vcombine.high %v374_v23, %v378_v24  ;;  %v382_v28 = vld [vmem:[%s2231_s3 + $0x140] sm:$0xff]  ;;  %v1309_v32 = vcombine.low %v374_v23, %v378_v24  ;;  %v379_v50 = vld [vmem:[%s2231_s3 + $0x128] sm:$0xff]  ;;  %p1527_p1 = scmp.lt.s32.totalorder %s1525_s12, %s1519_s11 }
  0x1b   : > { %1366 = vmatpush3.bf16.msra.mxu0 %v1440_v3  ;;  %731 = vmatpush1.bf16.msra.mxu1 %v1293_v20  ;;  %v386_v29 = vld [vmem:[%s2231_s3 + $0x160] sm:$0xff]  ;;  %v1312_v52 = vcombine.high %v375_v49, %v379_v50  ;;  %v383_v53 = vld [vmem:[%s2231_s3 + $0x148] sm:$0xff]  ;;  %v1311_v55 = vcombine.low %v375_v49, %v379_v50  ;;  %v372_v49 = vld [vmem:[%s2231_s3 + $0xf0] sm:$0xff]  ;;  %p1521_p12 = pnand %p1520_p11, %p1650_p5 }
  0x1c   : > { %1367 = vmatprep.subr.bf16.mxu0 %v1441_v11  ;;  %732 = vmatprep.subr.bf16.mxu1 %v1302_v21  ;;  %v1318_v33 = vcombine.high %v382_v28, %v386_v29  ;;  %v1317_v38 = vcombine.low %v382_v28, %v386_v29  ;;  %v387_v54 = vld [vmem:[%s2231_s3 + $0x168] sm:$0xff]  ;;  %v390_v58 = vld [vmem:[%s2231_s3 + $0x180] sm:$0xff]  ;;  %v352_v28 = vld [vmem:[%s2231_s3 + $0x50] sm:$0xff]  ;;  %p1528_p2 = por %p1527_p1, %p1526_p0 }
  0x1d   : > { %v1320_v56 = vcombine.high %v383_v53, %v387_v54  ;;  %v1319_v57 = vcombine.low %v383_v53, %v387_v54  ;;  %v394_v59 = vld [vmem:[%s2231_s3 + $0x1a0] sm:$0xff]  ;;  %v391_v60 = vld [vmem:[%s2231_s3 + $0x188] sm:$0xff]  ;;  %v369_v50 = vld [vmem:[%s2231_s3 + $0xd8] sm:$0xff]  ;;  %p1522_p13 = pneg %p1521_p12 }
  0x1e   : > { %v1326_v61 = vcombine.high %v390_v58, %v394_v59  ;;  %v395_v62 = vld [vmem:[%s2231_s3 + $0x1a8] sm:$0xff]  ;;  %v1325_v1 = vcombine.low %v390_v58, %v394_v59  ;;  %v398_v2 = vld [vmem:[%s2231_s3 + $0x1c0] sm:$0xff]  ;;  %v377_v58 = vld [vmem:[%s2231_s3 + $0x118] sm:$0xff] }
  0x1f   : > { %1368 = vmatpush3.bf16.msra.mxu0 %v1441_v11  ;;  %733 = vmatpush1.bf16.msra.mxu1 %v1301_v25  ;;  %v1327_v63 = vcombine.low %v391_v60, %v395_v62  ;;  %v1328_v0 = vcombine.high %v391_v60, %v395_v62  ;;  %v402_v3 = vld [vmem:[%s2231_s3 + $0x1e0] sm:$0xff]  ;;  %v399_v4 = vld [vmem:[%s2231_s3 + $0x1c8] sm:$0xff]  ;;  %v348_v11 = vld [vmem:[%s2231_s3 + $0x30] sm:$0xff]  ;;  %p1529_p3 = pnand %p1528_p2, %p1522_p13 }
  0x20   : > { %1369 = vmatprep.subr.bf16.mxu0 %v1442_v17  ;;  %734 = vmatprep.subr.bf16.mxu1 %v1310_v26  ;;  %v1334_v5 = vcombine.high %v398_v2, %v402_v3  ;;  %v403_v6 = vld [vmem:[%s2231_s3 + $0x1e8] sm:$0xff]  ;;  %v1333_v9 = vcombine.low %v398_v2, %v402_v3  ;;  %v1282_v13 = vcombine.high %v344_v10, %v348_v11  ;;  %v1266_v19 = vld [vmem:[%s2230_s2] ss:$0 sm:$0xff]  ;;  %v381_v59 = vld [vmem:[%s2231_s3 + $0x138] sm:$0xff] }
  0x21   : > { %v1335_v7 = vcombine.low %v399_v4, %v403_v6  ;;  %v1336_v8 = vcombine.high %v399_v4, %v403_v6  ;;  %v1281_v15 = vcombine.low %v344_v10, %v348_v11  ;;  %v385_v2 = vld [vmem:[%s2231_s3 + $0x158] sm:$0xff] }
  0x22   : > { %v389_v3 = vld [vmem:[%s2231_s3 + $0x178] sm:$0xff] }
  0x23   : > { %1370 = vmatpush3.bf16.msra.mxu0 %v1442_v17  ;;  %735 = vmatpush1.bf16.msra.mxu1 %v1309_v32  ;;  %v1802_v17 = vcombine.high %v345_v12, %v349_v14  ;;  %v353_v32 = vld [vmem:[%s2231_s3 + $0x58] sm:$0xff] }
  0x24   : > { %1371 = vmatprep.subr.bf16.mxu0 %v1443_v22  ;;  %736 = vmatprep.subr.bf16.mxu1 %v1318_v33  ;;  %v357_v33 = vld [vmem:[%s2231_s3 + $0x78] sm:$0xff] }
  0x25   : > { %v1843_v45 = vcombine.low %v353_v32, %v357_v33  ;;  %v393_v10 = vld [vmem:[%s2231_s3 + $0x198] sm:$0xff] }
  0x26   : > { %v397_v11 = vld [vmem:[%s2231_s3 + $0x1b8] sm:$0xff] }
  0x27   : > { %1372 = vmatpush3.bf16.msra.mxu0 %v1443_v22  ;;  %737 = vmatpush1.bf16.msra.mxu1 %v1317_v38  ;;  %v1290_v38 = vcombine.high %v352_v28, %v356_v31 }
  0x28   : > { %1373 = vmatprep.subr.bf16.mxu0 %v1444_v27  ;;  %738 = vmatprep.subr.bf16.mxu1 %v1326_v61 }
  0x2b   : > { %1374 = vmatpush3.bf16.msra.mxu0 %v1444_v27  ;;  %739 = vmatpush1.bf16.msra.mxu1 %v1325_v1  ;;  %v388_v1 = vld [vmem:[%s2231_s3 + $0x170] sm:$0xff] }
  0x2c   : > { %779 = vmatprep.subr.bf16.mxu0 %v1280_v34  ;;  %740 = vmatprep.subr.bf16.mxu1 %v1334_v5  ;;  %v1315_v5 = vcombine.low %v377_v58, %v381_v59 }
  0x2e   : > { %1376 = vmatmul.mubr.bf16.vlgmr.msra.gmra.mrb[0].mxu0 %v1446_v37 }
  0x2f   : > { %780 = vmatpush1.bf16.msra.mxu0 %v1279_v39  ;;  %741 = vmatpush1.bf16.msra.mxu1 %v1333_v9  ;;  %v1826_v39 = vcombine.high %v353_v32, %v357_v33  ;;  %v396_v9 = vld [vmem:[%s2231_s3 + $0x1b0] sm:$0xff] }
  0x30   : > { %781 = vmatprep.subr.bf16.mxu0 %v1288_v40  ;;  %811 = vmatprep.mubr.bf16.mxu0 %v1583_v18  ;;  %v360_v40 = vld [vmem:[%s2231_s3 + $0x90] sm:$0xff] }
  0x31   : > { %832 = vmatprep.subr.bf16.mxu1 %v1282_v13  ;;  %v1298_v46 = vcombine.high %v360_v40, %v364_v41  ;;  %v1323_v13 = vcombine.low %v385_v2, %v389_v3 }
  0x33   : > { %782 = vmatpush1.bf16.msra.mxu0 %v1287_v43  ;;  %v365_v43 = vld [vmem:[%s2231_s3 + $0xb8] sm:$0xff] }
  0x34   : > { %783 = vmatprep.subr.bf16.mxu0 %v1296_v44  ;;  %v1289_v44 = vcombine.low %v352_v28, %v356_v31  ;;  %v1863_v53 = vcombine.low %v361_v42, %v365_v43 }
  0x37   : > { %784 = vmatpush1.bf16.msra.mxu0 %v1295_v47  ;;  %v1846_v47 = vcombine.high %v361_v42, %v365_v43 }
  0x38   : > { %785 = vmatprep.subr.bf16.mxu0 %v1304_v48  ;;  %v368_v48 = vld [vmem:[%s2231_s3 + $0xd0] sm:$0xff] }
  0x39   : > { %v1306_v54 = vcombine.high %v368_v48, %v372_v49  ;;  %v1305_v60 = vcombine.low %v368_v48, %v372_v49 }
  0x3b   : > { %786 = vmatpush1.bf16.msra.mxu0 %v1303_v51  ;;  %v373_v51 = vld [vmem:[%s2231_s3 + $0xf8] sm:$0xff] }
  0x3c   : > { %787 = vmatprep.subr.bf16.mxu0 %v1312_v52  ;;  %v1297_v52 = vcombine.low %v360_v40, %v364_v41  ;;  %v1307_v61 = vcombine.low %v369_v50, %v373_v51 }
  0x3f   : > { %788 = vmatpush1.bf16.msra.mxu0 %v1311_v55  ;;  %v1866_v55 = vcombine.high %v369_v50, %v373_v51 }
  0x40   : > { %789 = vmatprep.subr.bf16.mxu0 %v1320_v56  ;;  %v376_v56 = vld [vmem:[%s2231_s3 + $0x110] sm:$0xff] }
  0x43   : > { %790 = vmatpush1.bf16.msra.mxu0 %v1319_v57  ;;  %v380_v57 = vld [vmem:[%s2231_s3 + $0x130] sm:$0xff] }
  0x44   : > { %791 = vmatprep.subr.bf16.mxu0 %v1328_v0  ;;  %v1314_v62 = vcombine.high %v376_v56, %v380_v57  ;;  %v384_v0 = vld [vmem:[%s2231_s3 + $0x150] sm:$0xff]  ;;  %v1313_v4 = vcombine.low %v376_v56, %v380_v57 }
  0x45   : > { %v1322_v6 = vcombine.high %v384_v0, %v388_v1  ;;  %v1321_v12 = vcombine.low %v384_v0, %v388_v1 }
  0x47   : > { %792 = vmatpush1.bf16.msra.mxu0 %v1327_v63  ;;  %v1316_v63 = vcombine.high %v377_v58, %v381_v59 }
  0x48   : > { %793 = vmatprep.subr.bf16.mxu0 %v1336_v8  ;;  %v392_v8 = vld [vmem:[%s2231_s3 + $0x190] sm:$0xff] }
  0x49   : > { %v1330_v14 = vcombine.high %v392_v8, %v396_v9 }
  0x4b   : > { %794 = vmatpush1.bf16.msra.mxu0 %v1335_v7  ;;  %v1324_v7 = vcombine.high %v385_v2, %v389_v3 }
  0x4c   : > { %885 = vmatprep.subr.bf16.mxu0 %v1802_v17 }
 0x101   : > { %v1377_v20 = vpop.f32.mrb[0].mxu0 }
 0x102   : > { %v330_v21 = vadd.f32 %v1377_v20, %v1266_v19  ;;  %v321_v22 = vpop.f32.mrb[1].mxu0  ;;  %v404_v20 = vld [vmem:[%s2231_s3 + $0x1f0] sm:$0xff] }
 0x103   : > { %v322_v23 = vadd.f32 %v1266_v19, %v321_v22  ;;  %v1378_v24 = vpop.f32.mrb[2].mxu0  ;;  %v405_v22 = vld [vmem:[%s2231_s3 + $0x1f8] sm:$0xff] }
 0x104   : > { %v333_v25 = vadd.f32 %v1378_v24, %v1266_v19  ;;  %v324_v26 = vpop.f32.mrb[3].mxu0  ;;  %v338_v29 = vmax.f32 %v330_v21, 0.0  ;;  %v401_v21 = vld [vmem:[%s2231_s3 + $0x1d8] sm:$0xff]  ;;  %v1331_v24 = vcombine.low %v393_v10, %v397_v11 }
 0x105   : > { %v325_v27 = vadd.f32 %v1266_v19, %v324_v26  ;;  %v336_v34 = vmax.f32 %v322_v23, 0.0  ;;  %v400_v19 = vld [vmem:[%s2231_s3 + $0x1d0] sm:$0xff]  ;;  %v1329_v23 = vcombine.low %v392_v8, %v396_v9  ;;  %v1340_v26 = vcombine.high %v401_v21, %v405_v22 }
 0x106   : > { %v339_v30 = vmax.f32 %v333_v25, 0.0  ;;  %v1338_v25 = vcombine.high %v400_v19, %v404_v20  ;;  %v1339_v28 = vcombine.low %v401_v21, %v405_v22 }
 0x107   : > { %v337_v35 = vmax.f32 %v325_v27, 0.0  ;;  %v1337_v27 = vcombine.low %v400_v19, %v404_v20 }
 0x108   : > { %v1822_v36 = vpack.c.bf16 %v339_v30, %v338_v29 }
 0x109   : > { %v1824_v37 = vpack.c.bf16 %v337_v35, %v336_v34 }
 0x10b   : > { %759 = vmatmul.mubr.bf16.vlgmr.msra.gmra.mrb[0].mxu1 %v1824_v37  ;;  %812 = vmatmul.mubr.bf16.vlgmr.msra.gmra.mrb[4].mxu0 %v1824_v37 }
 0x10c   : > { %833 = vmatpush1.bf16.msra.mxu1 %v1281_v15  ;;  %886 = vmatpush1.bf16.msra.mxu0 %v1800_v16  ;;  %v1332_v15 = vcombine.high %v393_v10, %v397_v11 }
 0x10d   : > { %834 = vmatprep.subr.bf16.mxu1 %v1290_v38  ;;  %887 = vmatprep.subr.bf16.mxu0 %v1826_v39 }
 0x10e   : > { %768 = vmatprep.mubr.bf16.mxu1 %v1583_v18  ;;  %821 = vmatprep.mubr.bf16.mxu0 %v1583_v18 }
 0x110   : > { %835 = vmatpush1.bf16.msra.mxu1 %v1289_v44  ;;  %888 = vmatpush1.bf16.msra.mxu0 %v1843_v45 }
 0x111   : > { %836 = vmatprep.subr.bf16.mxu1 %v1298_v46  ;;  %889 = vmatprep.subr.bf16.mxu0 %v1846_v47 }
 0x113   : > { %769 = vmatmul.mubr.bf16.gmra.mrb[4].mxu1 %v1822_v36  ;;  %822 = vmatmul.mubr.bf16.gmra.mrb[8].mxu0 %v1822_v36 }
 0x114   : > { %837 = vmatpush1.bf16.msra.mxu1 %v1297_v52  ;;  %890 = vmatpush1.bf16.msra.mxu0 %v1863_v53 }
 0x115   : > { %838 = vmatprep.subr.bf16.mxu1 %v1306_v54  ;;  %891 = vmatprep.subr.bf16.mxu0 %v1866_v55 }
 0x116   : > { %864 = vmatprep.mubr.bf16.mxu1 %v1583_v18  ;;  %917 = vmatprep.mubr.bf16.mxu0 %v1583_v18 }
 0x118   : > { %839 = vmatpush1.bf16.msra.mxu1 %v1305_v60  ;;  %892 = vmatpush1.bf16.msra.mxu0 %v1307_v61 }
 0x119   : > { %840 = vmatprep.subr.bf16.mxu1 %v1314_v62  ;;  %893 = vmatprep.subr.bf16.mxu0 %v1316_v63 }
 0x11c   : > { %841 = vmatpush1.bf16.msra.mxu1 %v1313_v4  ;;  %894 = vmatpush1.bf16.msra.mxu0 %v1315_v5 }
 0x11d   : > { %842 = vmatprep.subr.bf16.mxu1 %v1322_v6  ;;  %895 = vmatprep.subr.bf16.mxu0 %v1324_v7 }
 0x120   : > { %843 = vmatpush1.bf16.msra.mxu1 %v1321_v12  ;;  %896 = vmatpush1.bf16.msra.mxu0 %v1323_v13 }
 0x121   : > { %844 = vmatprep.subr.bf16.mxu1 %v1330_v14  ;;  %897 = vmatprep.subr.bf16.mxu0 %v1332_v15 }
 0x124   : > { %845 = vmatpush1.bf16.msra.mxu1 %v1329_v23  ;;  %898 = vmatpush1.bf16.msra.mxu0 %v1331_v24 }
 0x125   : > { %846 = vmatprep.subr.bf16.mxu1 %v1338_v25  ;;  %899 = vmatprep.subr.bf16.mxu0 %v1340_v26 }
 0x128   : > { %847 = vmatpush1.bf16.msra.mxu1 %v1337_v27  ;;  %900 = vmatpush1.bf16.msra.mxu0 %v1339_v28 }
 0x129   : > { %1379 = vmatprep.subr.bf16.mxu1 %v1802_v17 }
 0x12b   : > { %865 = vmatmul.mubr.bf16.vlgmr.msra.gmra.mrb[8].mxu1 %v1824_v37  ;;  %918 = vmatmul.mubr.bf16.vlgmr.msra.gmra.mrb[12].mxu0 %v1824_v37 }
 0x12c   : > { %1387 = vmatpush1.bf16.msra.mxu1 %v1800_v16  ;;  %874 = vmatprep.mubr.bf16.mxu1 %v1583_v18 }
 0x12d   : > { %1380 = vmatprep.subr.bf16.mxu1 %v1826_v39 }
 0x130   : > { %1388 = vmatpush1.bf16.msra.mxu1 %v1843_v45 }
 0x131   : > { %1381 = vmatprep.subr.bf16.mxu1 %v1846_v47 }
 0x133   : > { %875 = vmatmul.mubr.bf16.gmra.mrb[12].mxu1 %v1822_v36 }
 0x134   : > { %1389 = vmatpush1.bf16.msra.mxu1 %v1863_v53  ;;  %927 = vmatprep.mubr.bf16.mxu1 %v1583_v18 }
 0x135   : > { %1382 = vmatprep.subr.bf16.mxu1 %v1866_v55 }
 0x138   : > { %1390 = vmatpush1.bf16.msra.mxu1 %v1307_v61 }
 0x139   : > { %1383 = vmatprep.subr.bf16.mxu1 %v1316_v63 }
 0x13c   : > { %1391 = vmatpush1.bf16.msra.mxu1 %v1315_v5 }
 0x13d   : > { %1384 = vmatprep.subr.bf16.mxu1 %v1324_v7 }
 0x140   : > { %1392 = vmatpush1.bf16.msra.mxu1 %v1323_v13 }
 0x141   : > { %1385 = vmatprep.subr.bf16.mxu1 %v1332_v15 }
 0x144   : > { %1393 = vmatpush1.bf16.msra.mxu1 %v1331_v24 }
 0x145   : > { %1386 = vmatprep.subr.bf16.mxu1 %v1340_v26 }
 0x148   : > { %1394 = vmatpush1.bf16.msra.mxu1 %v1339_v28 }
 0x14b   : > { %928 = vmatmul.mubr.bf16.vlgmr.msra.gmra.mrb[16].mxu1 %v1822_v36 }
 0x1de   : > { %v1935_v16 = vpop.f32.mrb[0].mxu1  ;;  %v1937_v17 = vpop.f32.mrb[4].mxu0 }
 0x1df   : > { %v1939_v29 = vpop.f32.mrb[1].mxu1  ;;  %v1941_v18 = vpop.f32.mrb[5].mxu0 }
 0x1e0   : > { %v938_v30 = vmax.f32 %v1935_v16, %v1939_v29  ;;  %v1945_v31 = vpop.f32.mrb[2].mxu1  ;;  %v1947_v32 = vpop.f32.mrb[6].mxu0 }
 0x1e1   : > { %v1949_v33 = vpop.f32.mrb[3].mxu1  ;;  %v1951_v34 = vpop.f32.mrb[7].mxu0 }
 0x1e2   : > { %v939_v35 = vmax.f32 %v938_v30, %v1937_v17  ;;  %v947_v36 = vmax.f32 %v1945_v31, %v1949_v33 }
 0x1e4   : > { %v940_v37 = vmax.f32 %v939_v35, %v1941_v18  ;;  %v948_v38 = vmax.f32 %v947_v36, %v1947_v32 }
 0x1e6   : > { %v949_v39 = vmax.f32 %v948_v38, %v1951_v34  ;;  %v1959_v40 = vpop.f32.mrb[4].mxu1  ;;  %v1961_v41 = vpop.f32.mrb[8].mxu0 }
 0x1e7   : > { %v1963_v42 = vpop.f32.mrb[5].mxu1  ;;  %v1965_v43 = vpop.f32.mrb[9].mxu0 }
 0x1e8   : > { %v956_v44 = vmax.f32 %v1959_v40, %v1963_v42  ;;  %v1969_v45 = vpop.f32.mrb[6].mxu1  ;;  %v1971_v46 = vpop.f32.mrb[10].mxu0 }
 0x1e9   : > { %v1973_v47 = vpop.f32.mrb[7].mxu1  ;;  %v1975_v48 = vpop.f32.mrb[11].mxu0 }
 0x1ea   : > { %v957_v49 = vmax.f32 %v956_v44, %v1961_v41  ;;  %v965_v50 = vmax.f32 %v1969_v45, %v1973_v47 }
 0x1ec   : > { %v958_v51 = vmax.f32 %v957_v49, %v1965_v43  ;;  %v966_v52 = vmax.f32 %v965_v50, %v1971_v46 }
 0x1ee   : > { %v967_v53 = vmax.f32 %v966_v52, %v1975_v48 }
 0x1fe   : > { %v1983_v54 = vpop.f32.mrb[8].mxu1  ;;  %v1985_v55 = vpop.f32.mrb[12].mxu0 }
 0x1ff   : > { %v941_v56 = vmax.f32 %v940_v37, %v1983_v54  ;;  %v1988_v57 = vpop.f32.mrb[9].mxu1  ;;  %v1990_v58 = vpop.f32.mrb[13].mxu0 }
 0x200   : > { %v1992_v59 = vpop.f32.mrb[10].mxu1  ;;  %v1994_v60 = vpop.f32.mrb[14].mxu0 }
 0x201   : > { %v942_v61 = vmax.f32 %v941_v56, %v1988_v57  ;;  %v950_v62 = vmax.f32 %v949_v39, %v1992_v59  ;;  %v1998_v63 = vpop.f32.mrb[11].mxu1  ;;  %v2000_v0 = vpop.f32.mrb[15].mxu0 }
 0x203   : > { %v951_v1 = vmax.f32 %v950_v62, %v1998_v63  ;;  %v943_v2 = vmax.f32 %v942_v61, %v1985_v55 }
 0x205   : > { %v944_v3 = vmax.f32 %v943_v2, %v1990_v58  ;;  %v952_v4 = vmax.f32 %v951_v1, %v1994_v60 }
 0x206   : > { %v2006_v5 = vpop.f32.mrb[12].mxu1 }
 0x207   : > { %v959_v6 = vmax.f32 %v958_v51, %v2006_v5  ;;  %945 = vmax.xlane.f32.xlu0 %v944_v3  ;;  %v2009_v7 = vpop.f32.mrb[13].mxu1  ;;  %v953_v8 = vmax.f32 %v952_v4, %v2000_v0 }
 0x208   : > { %v2012_v9 = vpop.f32.mrb[14].mxu1 }
 0x209   : > { %v960_v10 = vmax.f32 %v959_v6, %v2009_v7  ;;  %v968_v11 = vmax.f32 %v967_v53, %v2012_v9  ;;  %v2016_v12 = vpop.f32.mrb[15].mxu1 }
 0x20b   : > { %v969_v13 = vmax.f32 %v968_v11, %v2016_v12  ;;  %954 = vmax.xlane.f32.xlu0 %v953_v8 }
 0x21e   : > { %v2019_v14 = vpop.f32.mrb[16].mxu1 }
 0x21f   : > { %v2021_v15 = vpop.f32.mrb[17].mxu1  ;;  %v961_v19 = vmax.f32 %v960_v10, %v2019_v14 }
 0x220   : > { %v2024_v20 = vpop.f32.mrb[18].mxu1 }
 0x221   : > { %v2026_v21 = vpop.f32.mrb[19].mxu1  ;;  %v962_v22 = vmax.f32 %v961_v19, %v2021_v15  ;;  %v970_v23 = vmax.f32 %v969_v13, %v2024_v20 }
 0x223   : > { %963 = vmax.xlane.f32.xlu1 %v962_v22  ;;  %v971_v24 = vmax.f32 %v970_v23, %v2026_v21 }
 0x227   : > { %972 = vmax.xlane.f32.xlu1 %v971_v24 }
 0x294   : > { %v2031_v25 = vpop.xlane.xlu0 %945 }
 0x295   : > { %v974_v26 = vsub.f32 %v1935_v16, %v2031_v25  ;;  %v975_v27 = vsub.f32 %v1939_v29, %v2031_v25  ;;  %v976_v28 = vsub.f32 %v1937_v17, %v2031_v25  ;;  %v977_v30 = vsub.f32 %v1941_v18, %v2031_v25 }
 0x296   : > { %v978_v35 = vsub.f32 %v1983_v54, %v2031_v25  ;;  %v979_v39 = vsub.f32 %v1988_v57, %v2031_v25  ;;  %v980_v52 = vsub.f32 %v1985_v55, %v2031_v25  ;;  %v981_v62 = vsub.f32 %v1990_v58, %v2031_v25 }
 0x297   : > { %v1006_v36 = vmul.f32 1.442695, %v974_v26  ;;  %v1008_v37 = vmul.f32 1.442695, %v975_v27  ;;  %v1010_v44 = vmul.f32 1.442695, %v976_v28 }
 0x298   : > { %v2043_v38 = vpop.xlane.xlu0 %954  ;;  %v1012_v51 = vmul.f32 1.442695, %v977_v30  ;;  %v1014_v53 = vmul.f32 1.442695, %v978_v35  ;;  %v1016_v56 = vmul.f32 1.442695, %v979_v39 }
 0x299   : > { %v982_v49 = vsub.f32 %v1945_v31, %v2043_v38  ;;  %1447 = vpow2.f32 %v1006_v36  ;;  %v983_v50 = vsub.f32 %v1949_v33, %v2043_v38  ;;  %v984_v61 = vsub.f32 %v1947_v32, %v2043_v38 }
 0x29a   : > { %1449 = vpow2.f32 %v1008_v37  ;;  %v985_v2 = vsub.f32 %v1951_v34, %v2043_v38  ;;  %v1018_v4 = vmul.f32 1.442695, %v980_v52  ;;  %v986_v6 = vsub.f32 %v1992_v59, %v2043_v38 }
 0x29b   : > { %1451 = vpow2.f32 %v1010_v44  ;;  %v1022_v1 = vmul.f32 1.442695, %v982_v49  ;;  %v1024_v3 = vmul.f32 1.442695, %v983_v50  ;;  %v1026_v8 = vmul.f32 1.442695, %v984_v61 }
 0x29c   : > { %1453 = vpow2.f32 %v1012_v51  ;;  %v1020_v10 = vmul.f32 1.442695, %v981_v62  ;;  %v987_v11 = vsub.f32 %v1998_v63, %v2043_v38  ;;  %v1028_v13 = vmul.f32 1.442695, %v985_v2 }
 0x29d   : > { %1455 = vpow2.f32 %v1014_v53  ;;  %v988_v23 = vsub.f32 %v1994_v60, %v2043_v38  ;;  %v1030_v24 = vmul.f32 1.442695, %v986_v6  ;;  %v989_v28 = vsub.f32 %v2000_v0, %v2043_v38 }
 0x29e   : > { %1457 = vpow2.f32 %v1016_v56  ;;  %v1032_v30 = vmul.f32 1.442695, %v987_v11 }
 0x29f   : > { %1459 = vpow2.f32 %v1022_v1  ;;  %v1034_v37 = vmul.f32 1.442695, %v988_v23  ;;  %v1036_v50 = vmul.f32 1.442695, %v989_v28 }
 0x2a0   : > { %1461 = vpow2.f32 %v1024_v3 }
 0x2a1   : > { %1463 = vpow2.f32 %v1018_v4 }
 0x2a2   : > { %1465 = vpow2.f32 %v1026_v8 }
 0x2a3   : > { %v1448_v19 = vpop.eup %1447  ;;  %1467 = vpow2.f32 %v1020_v10 }
 0x2a4   : > { %v1450_v22 = vpop.eup %1449  ;;  %1469 = vpow2.f32 %v1028_v13 }
 0x2a5   : > { %v1070_v26 = vadd.f32 %v1450_v22, %v1448_v19  ;;  %v1452_v27 = vpop.eup %1451  ;;  %1471 = vpow2.f32 %v1030_v24 }
 0x2a6   : > { %v1454_v36 = vpop.eup %1453  ;;  %1473 = vpow2.f32 %v1032_v30 }
 0x2a7   : > { %v1071_v35 = vadd.f32 %v1452_v27, %v1070_v26  ;;  %v1456_v39 = vpop.eup %1455  ;;  %1475 = vpow2.f32 %v1034_v37 }
 0x2a8   : > { %v1458_v49 = vpop.eup %1457  ;;  %1477 = vpow2.f32 %v1036_v50 }
 0x2a9   : > { %v1072_v44 = vadd.f32 %v1454_v36, %v1071_v35  ;;  %v1460_v51 = vpop.eup %1459 }
 0x2aa   : > { %v1462_v53 = vpop.eup %1461 }
 0x2ab   : > { %v1073_v52 = vadd.f32 %v1456_v39, %v1072_v44  ;;  %v1464_v56 = vpop.eup %1463  ;;  %v1079_v62 = vadd.f32 %v1462_v53, %v1460_v51 }
 0x2ac   : > { %v1466_v1 = vpop.eup %1465 }
 0x2ad   : > { %v1074_v61 = vadd.f32 %v1458_v49, %v1073_v52  ;;  %v1468_v2 = vpop.eup %1467  ;;  %v1080_v4 = vadd.f32 %v1466_v1, %v1079_v62 }
 0x2ae   : > { %v1470_v6 = vpop.eup %1469 }
 0x2af   : > { %v1075_v3 = vadd.f32 %v1464_v56, %v1074_v61  ;;  %v1081_v19 = vadd.f32 %v1470_v6, %v1080_v4  ;;  %v1472_v22 = vpop.eup %1471 }
 0x2b0   : > { %v2067_v8 = vpop.xlane.xlu1 %963  ;;  %v1474_v30 = vpop.eup %1473 }
 0x2b1   : > { %v990_v10 = vsub.f32 %v1959_v40, %v2067_v8  ;;  %v991_v11 = vsub.f32 %v1963_v42, %v2067_v8  ;;  %v1076_v13 = vadd.f32 %v1468_v2, %v1075_v3  ;;  %v992_v23 = vsub.f32 %v1961_v41, %v2067_v8  ;;  %v1476_v49 = vpop.eup %1475 }
 0x2b2   : > { %v993_v24 = vsub.f32 %v1965_v43, %v2067_v8  ;;  %v1082_v26 = vadd.f32 %v1472_v22, %v1081_v19  ;;  %v994_v27 = vsub.f32 %v2006_v5, %v2067_v8  ;;  %v995_v36 = vsub.f32 %v2009_v7, %v2067_v8  ;;  %v1478_v62 = vpop.eup %1477 }
 0x2b3   : > { %1077 = vadd.xlane.f32.xlu0 %v1076_v13  ;;  %v1038_v28 = vmul.f32 1.442695, %v990_v10  ;;  %v1040_v37 = vmul.f32 1.442695, %v991_v11  ;;  %v1042_v39 = vmul.f32 1.442695, %v992_v23  ;;  %v996_v56 = vsub.f32 %v2019_v14, %v2067_v8 }
 0x2b4   : > { %v2079_v35 = vpop.xlane.xlu1 %972  ;;  %v1083_v44 = vadd.f32 %v1474_v30, %v1082_v26  ;;  %v1044_v52 = vmul.f32 1.442695, %v993_v24  ;;  %v1046_v61 = vmul.f32 1.442695, %v994_v27  ;;  %v1048_v1 = vmul.f32 1.442695, %v995_v36 }
 0x2b5   : > { %1479 = vpow2.f32 %v1038_v28  ;;  %v998_v50 = vsub.f32 %v1969_v45, %v2079_v35  ;;  %v999_v51 = vsub.f32 %v1973_v47, %v2079_v35  ;;  %v1000_v2 = vsub.f32 %v1971_v46, %v2079_v35 }
 0x2b6   : > { %1481 = vpow2.f32 %v1040_v37  ;;  %v1084_v53 = vadd.f32 %v1476_v49, %v1083_v44  ;;  %v997_v4 = vsub.f32 %v2021_v15, %v2067_v8  ;;  %v1001_v6 = vsub.f32 %v1975_v48, %v2079_v35 }
 0x2b7   : > { %1483 = vpow2.f32 %v1042_v39  ;;  %v1054_v10 = vmul.f32 1.442695, %v998_v50  ;;  %v1056_v11 = vmul.f32 1.442695, %v999_v51  ;;  %v1050_v13 = vmul.f32 1.442695, %v996_v56 }
 0x2b8   : > { %v1085_v3 = vadd.f32 %v1478_v62, %v1084_v53  ;;  %1485 = vpow2.f32 %v1044_v52  ;;  %v1002_v19 = vsub.f32 %v2012_v9, %v2079_v35  ;;  %v1058_v22 = vmul.f32 1.442695, %v1000_v2 }
 0x2b9   : > { %1487 = vpow2.f32 %v1046_v61  ;;  %v1052_v23 = vmul.f32 1.442695, %v997_v4  ;;  %v1003_v24 = vsub.f32 %v2016_v12, %v2079_v35  ;;  %v1060_v26 = vmul.f32 1.442695, %v1001_v6 }
 0x2ba   : > { %1086 = vadd.xlane.f32.xlu1 %v1085_v3  ;;  %1489 = vpow2.f32 %v1048_v1  ;;  %v1004_v30 = vsub.f32 %v2024_v20, %v2079_v35  ;;  %v1062_v36 = vmul.f32 1.442695, %v1002_v19  ;;  %v1005_v44 = vsub.f32 %v2026_v21, %v2079_v35 }
 0x2bb   : > { %1491 = vpow2.f32 %v1054_v10  ;;  %v1064_v49 = vmul.f32 1.442695, %v1003_v24 }
 0x2bc   : > { %1493 = vpow2.f32 %v1056_v11  ;;  %v1066_v52 = vmul.f32 1.442695, %v1004_v30  ;;  %v1068_v62 = vmul.f32 1.442695, %v1005_v44 }
 0x2bd   : > { %1495 = vpow2.f32 %v1050_v13 }
 0x2be   : > { %1497 = vpow2.f32 %v1058_v22 }
 0x2bf   : > { %v1480_v27 = vpop.eup %1479  ;;  %1499 = vpow2.f32 %v1052_v23 }
 0x2c0   : > { %v1482_v28 = vpop.eup %1481  ;;  %1501 = vpow2.f32 %v1060_v26 }
 0x2c1   : > { %v1088_v37 = vadd.f32 %v1482_v28, %v1480_v27  ;;  %v1484_v39 = vpop.eup %1483  ;;  %1503 = vpow2.f32 %v1062_v36 }
 0x2c2   : > { %v1486_v51 = vpop.eup %1485  ;;  %1505 = vpow2.f32 %v1064_v49 }
 0x2c3   : > { %v1089_v50 = vadd.f32 %v1484_v39, %v1088_v37  ;;  %v1488_v53 = vpop.eup %1487  ;;  %1507 = vpow2.f32 %v1066_v52 }
 0x2c4   : > { %v1490_v61 = vpop.eup %1489  ;;  %1509 = vpow2.f32 %v1068_v62 }
 0x2c5   : > { %v1090_v56 = vadd.f32 %v1486_v51, %v1089_v50  ;;  %v1492_v1 = vpop.eup %1491 }
 0x2c6   : > { %v1494_v3 = vpop.eup %1493 }
 0x2c7   : > { %v1091_v2 = vadd.f32 %v1488_v53, %v1090_v56  ;;  %v1496_v4 = vpop.eup %1495  ;;  %v1097_v10 = vadd.f32 %v1494_v3, %v1492_v1 }
 0x2c8   : > { %v1498_v11 = vpop.eup %1497 }
 0x2c9   : > { %v1092_v6 = vadd.f32 %v1490_v61, %v1091_v2  ;;  %v1500_v13 = vpop.eup %1499  ;;  %v1098_v22 = vadd.f32 %v1498_v11, %v1097_v10 }
 0x2ca   : > { %v1502_v23 = vpop.eup %1501 }
 0x2cb   : > { %v1093_v19 = vadd.f32 %v1496_v4, %v1092_v6  ;;  %v1099_v26 = vadd.f32 %v1502_v23, %v1098_v22  ;;  %v1504_v27 = vpop.eup %1503 }
 0x2cc   : > { %v1506_v30 = vpop.eup %1505 }
 0x2cd   : > { %v1094_v24 = vadd.f32 %v1500_v13, %v1093_v19  ;;  %v1100_v28 = vadd.f32 %v1504_v27, %v1099_v26  ;;  %v1508_v37 = vpop.eup %1507 }
 0x2ce   : > { %v1510_v44 = vpop.eup %1509 }
 0x2cf   : > { %1095 = vadd.xlane.f32.xlu0 %v1094_v24  ;;  %v1101_v36 = vadd.f32 %v1506_v30, %v1100_v28 }
 0x2d1   : > { %v1102_v39 = vadd.f32 %v1508_v37, %v1101_v36 }
 0x2d3   : > { %v1103_v49 = vadd.f32 %v1510_v44, %v1102_v39 }
 0x2d5   : > { %1104 = vadd.xlane.f32.xlu1 %v1103_v49 }
 0x340   : > { %v1078_v50 = vpop.xlane.xlu0 %1077 }
 0x341   : > { %1511 = vlog2.f32 %v1078_v50 }
 0x347   : > { %v1087_v51 = vpop.xlane.xlu1 %1086 }
 0x348   : > { %1513 = vlog2.f32 %v1087_v51 }
 0x34b   : > { %v1512_v52 = vpop.eup %1511 }
 0x34c   : > { %v1107_v53 = vmul.f32 0.6931472, %v1512_v52 }
 0x34e   : > { %v1114_v56 = vadd.f32 %v1107_v53, %v2031_v25 }
 0x350   : > { %v1118_v61 = vsub.f32 %v1935_v16, %v1114_v56  ;;  %v1119_v62 = vsub.f32 %v1939_v29, %v1114_v56  ;;  %v1120_v1 = vsub.f32 %v1937_v17, %v1114_v56  ;;  %v1121_v2 = vsub.f32 %v1941_v18, %v1114_v56 }
 0x351   : > { %v1122_v3 = vsub.f32 %v1983_v54, %v1114_v56  ;;  %v1123_v4 = vsub.f32 %v1988_v57, %v1114_v56  ;;  %v1124_v6 = vsub.f32 %v1985_v55, %v1114_v56  ;;  %v1125_v10 = vsub.f32 %v1990_v58, %v1114_v56 }
 0x352   : > { %1150 = vst [vmem:[%s2115_s29] sm:$0xff] %v1118_v61  ;;  %1151 = vst [vmem:[%s2115_s29 + $0x8] sm:$0xff] %v1119_v62  ;;  %v1514_v16 = vpop.eup %1513 }
 0x353   : > { %1152 = vst [vmem:[%s2115_s29 + $0x10] sm:$0xff] %v1120_v1  ;;  %1153 = vst [vmem:[%s2115_s29 + $0x18] sm:$0xff] %v1121_v2  ;;  %v1109_v17 = vmul.f32 0.6931472, %v1514_v16 }
 0x354   : > { %1154 = vst [vmem:[%s2115_s29 + $0x20] sm:$0xff] %v1122_v3  ;;  %1155 = vst [vmem:[%s2115_s29 + $0x28] sm:$0xff] %v1123_v4 }
 0x355   : > { %1156 = vst [vmem:[%s2115_s29 + $0x30] sm:$0xff] %v1124_v6  ;;  %1157 = vst [vmem:[%s2115_s29 + $0x38] sm:$0xff] %v1125_v10  ;;  %v1115_v29 = vadd.f32 %v1109_v17, %v2043_v38 }
 0x357   : > { %v1126_v18 = vsub.f32 %v1945_v31, %v1115_v29  ;;  %v1127_v54 = vsub.f32 %v1949_v33, %v1115_v29  ;;  %v1128_v55 = vsub.f32 %v1947_v32, %v1115_v29  ;;  %v1129_v57 = vsub.f32 %v1951_v34, %v1115_v29 }
 0x358   : > { %v1130_v58 = vsub.f32 %v1992_v59, %v1115_v29  ;;  %v1131_v25 = vsub.f32 %v1998_v63, %v1115_v29  ;;  %v1132_v11 = vsub.f32 %v1994_v60, %v1115_v29  ;;  %v1133_v13 = vsub.f32 %v2000_v0, %v1115_v29 }
 0x359   : > { %1158 = vst [vmem:[%s2115_s29 + $0x40] sm:$0xff] %v1126_v18  ;;  %1159 = vst [vmem:[%s2115_s29 + $0x48] sm:$0xff] %v1127_v54 }
 0x35a   : > { %1160 = vst [vmem:[%s2115_s29 + $0x50] sm:$0xff] %v1128_v55  ;;  %1161 = vst [vmem:[%s2115_s29 + $0x58] sm:$0xff] %v1129_v57 }
 0x35b   : > { %1162 = vst [vmem:[%s2115_s29 + $0x60] sm:$0xff] %v1130_v58  ;;  %1163 = vst [vmem:[%s2115_s29 + $0x68] sm:$0xff] %v1131_v25 }
 0x35c   : > { %1164 = vst [vmem:[%s2115_s29 + $0x70] sm:$0xff] %v1132_v11  ;;  %1165 = vst [vmem:[%s2115_s29 + $0x78] sm:$0xff] %v1133_v13  ;;  %v1096_v31 = vpop.xlane.xlu0 %1095 }
 0x35d   : > { %1515 = vlog2.f32 %v1096_v31 }
 0x362   : > { %v1105_v32 = vpop.xlane.xlu1 %1104 }
 0x363   : > { %1517 = vlog2.f32 %v1105_v32 }
 0x367   : > { %v1516_v33 = vpop.eup %1515 }
 0x368   : > { %v1111_v34 = vmul.f32 0.6931472, %v1516_v33 }
 0x36a   : > { %v1116_v59 = vadd.f32 %v1111_v34, %v2067_v8 }
 0x36c   : > { %v1134_v60 = vsub.f32 %v1959_v40, %v1116_v59  ;;  %v1135_v63 = vsub.f32 %v1963_v42, %v1116_v59  ;;  %v1136_v0 = vsub.f32 %v1961_v41, %v1116_v59  ;;  %v1137_v38 = vsub.f32 %v1965_v43, %v1116_v59 }
 0x36d   : > { %v1138_v19 = vsub.f32 %v2006_v5, %v1116_v59  ;;  %v1139_v22 = vsub.f32 %v2009_v7, %v1116_v59  ;;  %v1140_v23 = vsub.f32 %v2019_v14, %v1116_v59  ;;  %v1141_v8 = vsub.f32 %v2021_v15, %v1116_v59  ;;  %v1518_v40 = vpop.eup %1517 }
 0x36e   : > { %1166 = vst [vmem:[%s2115_s29 + $0x80] sm:$0xff] %v1134_v60  ;;  %1167 = vst [vmem:[%s2115_s29 + $0x88] sm:$0xff] %v1135_v63  ;;  %v1113_v41 = vmul.f32 0.6931472, %v1518_v40 }
 0x36f   : > { %1168 = vst [vmem:[%s2115_s29 + $0x90] sm:$0xff] %v1136_v0  ;;  %1169 = vst [vmem:[%s2115_s29 + $0x98] sm:$0xff] %v1137_v38 }
 0x370   : > { %1170 = vst [vmem:[%s2115_s29 + $0xa0] sm:$0xff] %v1138_v19  ;;  %1171 = vst [vmem:[%s2115_s29 + $0xa8] sm:$0xff] %v1139_v22  ;;  %v1117_v42 = vadd.f32 %v1113_v41, %v2079_v35 }
 0x371   : > { %1172 = vst [vmem:[%s2115_s29 + $0xb0] sm:$0xff] %v1140_v23  ;;  %1173 = vst [vmem:[%s2115_s29 + $0xb8] sm:$0xff] %v1141_v8 }
 0x372   : > { %v1142_v43 = vsub.f32 %v1969_v45, %v1117_v42  ;;  %v1143_v5 = vsub.f32 %v1973_v47, %v1117_v42  ;;  %v1144_v7 = vsub.f32 %v1971_v46, %v1117_v42  ;;  %v1145_v14 = vsub.f32 %v1975_v48, %v1117_v42 }
 0x373   : > { %v1146_v45 = vsub.f32 %v2012_v9, %v1117_v42  ;;  %v1147_v47 = vsub.f32 %v2016_v12, %v1117_v42  ;;  %v1148_v15 = vsub.f32 %v2024_v20, %v1117_v42  ;;  %v1149_v46 = vsub.f32 %v2026_v21, %v1117_v42 }
 0x374   : > { %1174 = vst [vmem:[%s2115_s29 + $0xc0] sm:$0xff] %v1142_v43  ;;  %1175 = vst [vmem:[%s2115_s29 + $0xc8] sm:$0xff] %v1143_v5 }
 0x375   : > { %1176 = vst [vmem:[%s2115_s29 + $0xd0] sm:$0xff] %v1144_v7  ;;  %1177 = vst [vmem:[%s2115_s29 + $0xd8] sm:$0xff] %v1145_v14 }
 0x376   : > { %1178 = vst [vmem:[%s2115_s29 + $0xe0] sm:$0xff] %v1146_v45  ;;  %1179 = vst [vmem:[%s2115_s29 + $0xe8] sm:$0xff] %v1147_v47 }
 0x377   : > { %1180 = vst [vmem:[%s2115_s29 + $0xf0] sm:$0xff] %v1148_v15  ;;  %1181 = vst [vmem:[%s2115_s29 + $0xf8] sm:$0xff] %v1149_v46 }
 0x378   : > { %1532 = shalt.err (!%p1529_p3)
}
 0x379   : > { %s1533_s13 = scalar_lea.hbm %s2169_s19, 4096  ;;  %s1537_s22 = scalar_lea.hbm %s2232_s4, 8192 }
 0x37a   : > { %p1534_p4 = scmp.ne.s32.totalorder %s2169_s19, %s1533_s13  ;;  %p1538_p9 = scmp.lt.u32.totalorder %s2169_s19, %s2232_s4 }
 0x37b   : > { %p1539_p10 = scmp.lt.u32.totalorder %s1537_s22, %s1533_s13  ;;  %p1541_p12 = scmp.lt.u32.totalorder %s1533_s13, %s2169_s19 }
 0x37c   : > { %p1535_p7 = pnand %p1534_p4, %p1650_p5 }
 0x37d   : > { %p1540_p11 = por %p1539_p10, %p1538_p9 }
 0x37e   : > { %p1536_p8 = pneg %p1535_p7 }
 0x37f   : > { %p1542_p13 = por %p1541_p12, %p1540_p11 }
 0x381   : > { %p1543_p0 = pnand %p1542_p13, %p1536_p8 }
 0x383   : > { %1546 = shalt.err (!%p1543_p0)
}
 0x384   : > { %s1585_s28 = smov 1024   ;;  %s1586_s29 = smov 64  }
 0x385   : > { %1395 = dma.vmem_to_hbm [thread:$0]  (%p1650_p5), %s2171_s5, 4096, %s2169_s19, %s2187_s8, %s1585_s28, %s1585_s28, %s1586_s29  }
 0x386 PF: > { %p1401_p1 = scmp.ge.s32.totalorder %s1581_s18, 2  ;;  %s1212_s30 = sand.u32 1, %s1569_s15  }
 0x387   : > { %s1213_s6 = scalar_lea.sflag [#allocation3], %s1212_s30 }
 0x388   : > { %p1398_p2 = pnand %p1401_p1, %p1654_p6 }
 0x38a   : > { %1564 = dma.done.wait (!%p1398_p2), %s1213_s6, 4096  }
 0x38b   : > { %1566 = vsyncadd (!%p1398_p2), %s1213_s6, 4294963200  ;;  %p14_p3 = scmp.ge.s32.totalorder %s1637_s21, 4   ;;  %s2235_s15 = smov %s1573_s16 }
 0x38c   : > { %s2236_s16 = smov %s1577_s17  ;;  %s2237_s17 = smov %s1648_s24 }
 0x38d   : > { %s2238_s18 = smov %s1637_s21  ;;  %16 = sbr.rel (!%p14_p3) target bundleno = 3 (0x3), region = 71 }
 0x394   :  { %1218 = vsyncpa [#allocation3], 1 }
 0x395   :  { %1220 = vsyncpa [#allocation3 + $0x1], 1 }

</bundles_post_ra>
